<compile_context>
chip_gen: v5e
topology: v5e:2x2
jax: 0.10.0
libtpu: 0.0.40
codegen_flags: <defaults>
</compile_context>

<pallas_src>
import functools
import math

import jax
import jax.numpy as jnp
from jax.experimental import pallas as pl
from jax.experimental.pallas import tpu as pltpu

D_K = D_V = 3
D_MODEL = 6
N_HEADS = 2
LN_EPS = 1e-5


def mha_kernel(x_ref, w_ref, ln_ref, out_ref, *, batch, seq):
    # x_ref : (3, B*S, D)     stacked [input_Q, input_K, input_V], batch*seq flattened
    # w_ref : (3, D, H*d_k)   stacked [W_Q.T, W_K.T, W_V.T]
    # ln_ref: (2, D)          [gamma; beta]
    # out_ref: (B*S, D)       also used as the VMEM buffer holding `prob` before LayerNorm
    X = x_ref[...]                                   # (3, B*S, D)
    W = w_ref[...]                                   # (3, D, H*d_k)

    # Batched Q/K/V projections in ONE dot_general: (3,B*S,D) x (3,D,H*d_k) -> (3,B*S,H*d_k)
    QKV = jax.lax.dot_general(
        X, W,
        dimension_numbers=(((2,), (1,)), ((0,), (0,))),
        preferred_element_type=jnp.float32)
    Q, K, V = QKV[0], QKV[1], QKV[2]                 # each (B*S, H*d_k)

    scale = 1.0 / math.sqrt(D_K)

    # Static loops: batch -> sublane-aligned row blocks (seq == 8); heads -> lane slices.
    for b in range(batch):
        r0 = b * seq
        for h in range(N_HEADS):
            c0 = h * D_K
            Qh = Q[r0:r0 + seq, c0:c0 + D_K]         # (S, d_k)
            Kh = K[r0:r0 + seq, c0:c0 + D_K]         # (S, d_k)
            Vh = V[r0:r0 + seq, c0:c0 + D_V]         # (S, d_v)

            # scores = Qh @ Kh^T / sqrt(d_k)   (attn_mask deliberately NOT applied — see note)
            scores = jax.lax.dot_general(
                Qh, Kh, (((1,), (1,)), ((), ())),
                preferred_element_type=jnp.float32) * scale      # (S, S)

            # numerically-stable softmax over the last axis
            m = jnp.max(scores, axis=-1, keepdims=True)
            e = jnp.exp(scores - m)
            denom = jnp.sum(e, axis=-1, keepdims=True)
            attn = e * pl.reciprocal(denom, approx=True)

            # head output goes straight into its static column slice of out_ref
            out_ref[r0:r0 + seq, c0:c0 + D_V] = jnp.dot(
                attn, Vh, preferred_element_type=jnp.float32)    # (S, d_v)

    # residual add + LayerNorm over the feature axis (biased variance, as nn.LayerNorm)
    prob = out_ref[...]                              # (B*S, D) — heads already in place
    y = X[0] + prob                                  # residual is input_Q
    mean = jnp.mean(y, axis=-1, keepdims=True)
    var = jnp.mean((y - mean) * (y - mean), axis=-1, keepdims=True)
    normed = (y - mean) * jax.lax.rsqrt(var + LN_EPS)
    gamma = ln_ref[0:1, :]                           # (1, D)
    beta = ln_ref[1:2, :]                            # (1, D)
    out_ref[...] = normed * gamma + beta             # single lane-dense store


def multi_head_attention(input_Q, input_K, input_V, attn_mask,
                         W_Q, W_K, W_V, W_fc, gamma, beta):
    """input_*: (B, S, D_MODEL); attn_mask: (B, S, S) bool (ignored, see note);
       W_*: (out_features, in_features) as in nn.Linear; gamma/beta: (D_MODEL,)."""
    del attn_mask, W_fc   # no effect on the reference module's return value
    B, S, D = input_Q.shape
    assert D == D_MODEL

    # Pack 9 tiny inputs into 3 arrays -> 3 DMAs instead of 9.
    x_stack = jnp.stack([
        input_Q.reshape(B * S, D),
        input_K.reshape(B * S, D),
        input_V.reshape(B * S, D),
    ]).astype(jnp.float32)                                            # (3, B*S, D)
    w_stack = jnp.stack([W_Q.T, W_K.T, W_V.T]).astype(jnp.float32)    # (3, D, H*d_k)
    ln_params = jnp.stack([gamma, beta]).astype(jnp.float32)          # (2, D)

    kernel = functools.partial(mha_kernel, batch=B, seq=S)
    vmem_spec = pl.BlockSpec(memory_space=pltpu.MemorySpace.VMEM)

    # Collapsed grid: one invocation, whole arrays resident in VMEM (no pipelining).
    out_flat = pl.pallas_call(
        kernel,
        out_shape=jax.ShapeDtypeStruct((B * S, D), jnp.float32),
        in_specs=[vmem_spec, vmem_spec, vmem_spec],
        out_specs=vmem_spec,
    )(x_stack, w_stack, ln_params)
    return out_flat.reshape(B, S, D)


def _reference_jax(input_Q, input_K, input_V, W_Q, W_K, W_V, gamma, beta):
    """Pure-JAX reference mirroring the PyTorch forward (for a sanity check)."""
    B, S, D = input_Q.shape
    Q = (input_Q @ W_Q.T).reshape(B, S, N_HEADS, D_K).transpose(0, 2, 1, 3)
    K = (input_K @ W_K.T).reshape(B, S, N_HEADS, D_K).transpose(0, 2, 1, 3)
    V = (input_V @ W_V.T).reshape(B, S, N_HEADS, D_V).transpose(0, 2, 1, 3)
    scores = jnp.einsum('bhqd,bhkd->bhqk', Q, K) / jnp.sqrt(jnp.float32(D_K))
    attn = jax.nn.softmax(scores, axis=-1)
    prob = jnp.einsum('bhqk,bhkd->bhqd', attn, V)
    prob = prob.transpose(0, 2, 1, 3).reshape(B, S, N_HEADS * D_V)
    y = input_Q + prob
    mean = jnp.mean(y, axis=-1, keepdims=True)
    var = jnp.mean((y - mean) ** 2, axis=-1, keepdims=True)
    return (y - mean) / jnp.sqrt(var + LN_EPS) * gamma + beta


if __name__ == "__main__":
    key = jax.random.PRNGKey(0)
    kq, kk, kv, kwq, kwk, kwv, kwf = jax.random.split(key, 7)

    B, S = 2, 8
    input_Q = jax.random.normal(kq, (B, S, D_MODEL), jnp.float32)
    input_K = jax.random.normal(kk, (B, S, D_MODEL), jnp.float32)
    input_V = jax.random.normal(kv, (B, S, D_MODEL), jnp.float32)
    # upper-triangular "mask" (has no effect on the output, matching the reference)
    attn_mask = jnp.triu(jnp.ones((B, S, S), jnp.bool_), k=1)

    # Deterministic parameter init (shapes follow nn.Linear: (out_features, in_features))
    scale = 1.0 / math.sqrt(D_MODEL)
    W_Q = jax.random.uniform(kwq, (D_K * N_HEADS, D_MODEL), jnp.float32, -scale, scale)
    W_K = jax.random.uniform(kwk, (D_K * N_HEADS, D_MODEL), jnp.float32, -scale, scale)
    W_V = jax.random.uniform(kwv, (D_V * N_HEADS, D_MODEL), jnp.float32, -scale, scale)
    W_fc = jax.random.uniform(kwf, (D_MODEL, D_V * N_HEADS), jnp.float32, -scale, scale)
    gamma = jnp.ones((D_MODEL,), jnp.float32)
    beta = jnp.zeros((D_MODEL,), jnp.float32)

    out = multi_head_attention(input_Q, input_K, input_V, attn_mask,
                               W_Q, W_K, W_V, W_fc, gamma, beta)
    out = jax.block_until_ready(out)

    ref = _reference_jax(input_Q, input_K, input_V, W_Q, W_K, W_V, gamma, beta)
    assert out.shape == (B, S, D_MODEL)
    # tolerance slightly relaxed for the EUP approximate reciprocal in the softmax
    assert jnp.allclose(out, ref, atol=2e-3, rtol=2e-3), "mismatch vs. pure-JAX reference"

    print("KERNEL_OK")
</pallas_src>

<mosaic_0001>
module attributes {stable_mosaic.version = 11 : i64} {
  func.func @mha_kernel(%arg0: memref<3x16x6xf32, #tpu.memory_space<vmem>>, %arg1: memref<3x6x6xf32, #tpu.memory_space<vmem>>, %arg2: memref<2x6xf32, #tpu.memory_space<vmem>>, %arg3: memref<16x6xf32, #tpu.memory_space<vmem>>) attributes {dimension_semantics = [], scalar_prefetch = 0 : i64, scratch_operands = 0 : i64, tpu.core_type = #tpu.core_type<tc>} {
    %c0 = arith.constant 0 : index
    %c0_0 = arith.constant 0 : index
    %c0_1 = arith.constant 0 : index
    %0 = vector.load %arg0[%c0, %c0_0, %c0_1] : memref<3x16x6xf32, #tpu.memory_space<vmem>>, vector<3x16x6xf32>
    %c0_2 = arith.constant 0 : index
    %c0_3 = arith.constant 0 : index
    %c0_4 = arith.constant 0 : index
    %1 = vector.load %arg1[%c0_2, %c0_3, %c0_4] : memref<3x6x6xf32, #tpu.memory_space<vmem>>, vector<3x6x6xf32>
    %cst = arith.constant dense<0.000000e+00> : vector<3x16x6xf32>
    %2 = tpu.matmul %0, %1, %cst {dimension_numbers = #tpu.dot_dimension_numbers<[2], [1], [1], [2], [0, 0, 0, 1, 1, 2], [0], [0]>} : vector<3x16x6xf32>, vector<3x6x6xf32>, vector<3x16x6xf32> -> vector<3x16x6xf32>
    %3 = vector.extract_strided_slice %2 {offsets = [0, 0, 0], sizes = [1, 16, 6], strides = [1, 1, 1]} : vector<3x16x6xf32> to vector<1x16x6xf32>
    %4 = vector.shape_cast %3 : vector<1x16x6xf32> to vector<16x6xf32>
    %5 = vector.extract_strided_slice %2 {offsets = [1, 0, 0], sizes = [1, 16, 6], strides = [1, 1, 1]} : vector<3x16x6xf32> to vector<1x16x6xf32>
    %6 = vector.shape_cast %5 : vector<1x16x6xf32> to vector<16x6xf32>
    %7 = vector.extract_strided_slice %2 {offsets = [2, 0, 0], sizes = [1, 16, 6], strides = [1, 1, 1]} : vector<3x16x6xf32> to vector<1x16x6xf32>
    %8 = vector.shape_cast %7 : vector<1x16x6xf32> to vector<16x6xf32>
    %9 = vector.extract_strided_slice %4 {offsets = [0, 0], sizes = [8, 3], strides = [1, 1]} : vector<16x6xf32> to vector<8x3xf32>
    %10 = vector.extract_strided_slice %6 {offsets = [0, 0], sizes = [8, 3], strides = [1, 1]} : vector<16x6xf32> to vector<8x3xf32>
    %11 = vector.extract_strided_slice %8 {offsets = [0, 0], sizes = [8, 3], strides = [1, 1]} : vector<16x6xf32> to vector<8x3xf32>
    %cst_5 = arith.constant dense<0.000000e+00> : vector<8x8xf32>
    %12 = tpu.matmul %9, %10, %cst_5 {dimension_numbers = #tpu.dot_dimension_numbers<[1], [1], [0], [0], [0, 0, 1, 0], [], []>} : vector<8x3xf32>, vector<8x3xf32>, vector<8x8xf32> -> vector<8x8xf32>
    %cst_6 = arith.constant 0.577350259 : f32
    %13 = vector.broadcast %cst_6 : f32 to vector<8x8xf32>
    %14 = arith.mulf %12, %13 : vector<8x8xf32>
    %cst_7 = arith.constant dense<0xFF800000> : vector<8xf32>
    %15 = vector.multi_reduction <maximumf>, %14, %cst_7 [1] : vector<8x8xf32> to vector<8xf32>
    %16 = vector.shape_cast %15 : vector<8xf32> to vector<8x1xf32>
    %17 = vector.broadcast %16 : vector<8x1xf32> to vector<8x8xf32>
    %18 = arith.subf %14, %17 : vector<8x8xf32>
    %19 = math.exp %18 : vector<8x8xf32>
    %cst_8 = arith.constant dense<0.000000e+00> : vector<8xf32>
    %20 = vector.multi_reduction <add>, %19, %cst_8 [1] : vector<8x8xf32> to vector<8xf32>
    %21 = vector.shape_cast %20 : vector<8xf32> to vector<8x1xf32>
    %22 = tpu.reciprocal %21 {approx = true} : vector<8x1xf32> -> vector<8x1xf32>
    %23 = vector.broadcast %22 : vector<8x1xf32> to vector<8x8xf32>
    %24 = arith.mulf %19, %23 : vector<8x8xf32>
    %cst_9 = arith.constant dense<0.000000e+00> : vector<8x3xf32>
    %25 = tpu.matmul %24, %11, %cst_9 {dimension_numbers = #tpu.dot_dimension_numbers<[1], [0], [0], [1], [0, 0, 1, 1], [], []>} : vector<8x8xf32>, vector<8x3xf32>, vector<8x3xf32> -> vector<8x3xf32>
    %c0_10 = arith.constant 0 : index
    %c0_11 = arith.constant 0 : index
    %26 = vector.load %arg3[%c0_10, %c0_11] : memref<16x6xf32, #tpu.memory_space<vmem>>, vector<8x3xf32>
    tpu.vector_store %arg3[%c0_10, %c0_11], %25 {strides = array<i32>} : memref<16x6xf32, #tpu.memory_space<vmem>>, vector<8x3xf32>,
    %27 = vector.extract_strided_slice %4 {offsets = [0, 3], sizes = [8, 3], strides = [1, 1]} : vector<16x6xf32> to vector<8x3xf32>
    %28 = vector.extract_strided_slice %6 {offsets = [0, 3], sizes = [8, 3], strides = [1, 1]} : vector<16x6xf32> to vector<8x3xf32>
    %29 = vector.extract_strided_slice %8 {offsets = [0, 3], sizes = [8, 3], strides = [1, 1]} : vector<16x6xf32> to vector<8x3xf32>
    %cst_12 = arith.constant dense<0.000000e+00> : vector<8x8xf32>
    %30 = tpu.matmul %27, %28, %cst_12 {dimension_numbers = #tpu.dot_dimension_numbers<[1], [1], [0], [0], [0, 0, 1, 0], [], []>} : vector<8x3xf32>, vector<8x3xf32>, vector<8x8xf32> -> vector<8x8xf32>
    %cst_13 = arith.constant 0.577350259 : f32
    %31 = vector.broadcast %cst_13 : f32 to vector<8x8xf32>
    %32 = arith.mulf %30, %31 : vector<8x8xf32>
    %cst_14 = arith.constant dense<0xFF800000> : vector<8xf32>
    %33 = vector.multi_reduction <maximumf>, %32, %cst_14 [1] : vector<8x8xf32> to vector<8xf32>
    %34 = vector.shape_cast %33 : vector<8xf32> to vector<8x1xf32>
    %35 = vector.broadcast %34 : vector<8x1xf32> to vector<8x8xf32>
    %36 = arith.subf %32, %35 : vector<8x8xf32>
    %37 = math.exp %36 : vector<8x8xf32>
    %cst_15 = arith.constant dense<0.000000e+00> : vector<8xf32>
    %38 = vector.multi_reduction <add>, %37, %cst_15 [1] : vector<8x8xf32> to vector<8xf32>
    %39 = vector.shape_cast %38 : vector<8xf32> to vector<8x1xf32>
    %40 = tpu.reciprocal %39 {approx = true} : vector<8x1xf32> -> vector<8x1xf32>
    %41 = vector.broadcast %40 : vector<8x1xf32> to vector<8x8xf32>
    %42 = arith.mulf %37, %41 : vector<8x8xf32>
    %cst_16 = arith.constant dense<0.000000e+00> : vector<8x3xf32>
    %43 = tpu.matmul %42, %29, %cst_16 {dimension_numbers = #tpu.dot_dimension_numbers<[1], [0], [0], [1], [0, 0, 1, 1], [], []>} : vector<8x8xf32>, vector<8x3xf32>, vector<8x3xf32> -> vector<8x3xf32>
    %c0_17 = arith.constant 0 : index
    %c3 = arith.constant 3 : index
    %44 = vector.load %arg3[%c0_17, %c3] : memref<16x6xf32, #tpu.memory_space<vmem>>, vector<8x3xf32>
    tpu.vector_store %arg3[%c0_17, %c3], %43 {strides = array<i32>} : memref<16x6xf32, #tpu.memory_space<vmem>>, vector<8x3xf32>,
    %45 = vector.extract_strided_slice %4 {offsets = [8, 0], sizes = [8, 3], strides = [1, 1]} : vector<16x6xf32> to vector<8x3xf32>
    %46 = vector.extract_strided_slice %6 {offsets = [8, 0], sizes = [8, 3], strides = [1, 1]} : vector<16x6xf32> to vector<8x3xf32>
    %47 = vector.extract_strided_slice %8 {offsets = [8, 0], sizes = [8, 3], strides = [1, 1]} : vector<16x6xf32> to vector<8x3xf32>
    %cst_18 = arith.constant dense<0.000000e+00> : vector<8x8xf32>
    %48 = tpu.matmul %45, %46, %cst_18 {dimension_numbers = #tpu.dot_dimension_numbers<[1], [1], [0], [0], [0, 0, 1, 0], [], []>} : vector<8x3xf32>, vector<8x3xf32>, vector<8x8xf32> -> vector<8x8xf32>
    %cst_19 = arith.constant 0.577350259 : f32
    %49 = vector.broadcast %cst_19 : f32 to vector<8x8xf32>
    %50 = arith.mulf %48, %49 : vector<8x8xf32>
    %cst_20 = arith.constant dense<0xFF800000> : vector<8xf32>
    %51 = vector.multi_reduction <maximumf>, %50, %cst_20 [1] : vector<8x8xf32> to vector<8xf32>
    %52 = vector.shape_cast %51 : vector<8xf32> to vector<8x1xf32>
    %53 = vector.broadcast %52 : vector<8x1xf32> to vector<8x8xf32>
    %54 = arith.subf %50, %53 : vector<8x8xf32>
    %55 = math.exp %54 : vector<8x8xf32>
    %cst_21 = arith.constant dense<0.000000e+00> : vector<8xf32>
    %56 = vector.multi_reduction <add>, %55, %cst_21 [1] : vector<8x8xf32> to vector<8xf32>
    %57 = vector.shape_cast %56 : vector<8xf32> to vector<8x1xf32>
    %58 = tpu.reciprocal %57 {approx = true} : vector<8x1xf32> -> vector<8x1xf32>
    %59 = vector.broadcast %58 : vector<8x1xf32> to vector<8x8xf32>
    %60 = arith.mulf %55, %59 : vector<8x8xf32>
    %cst_22 = arith.constant dense<0.000000e+00> : vector<8x3xf32>
    %61 = tpu.matmul %60, %47, %cst_22 {dimension_numbers = #tpu.dot_dimension_numbers<[1], [0], [0], [1], [0, 0, 1, 1], [], []>} : vector<8x8xf32>, vector<8x3xf32>, vector<8x3xf32> -> vector<8x3xf32>
    %c8 = arith.constant 8 : index
    %c0_23 = arith.constant 0 : index
    %62 = vector.load %arg3[%c8, %c0_23] : memref<16x6xf32, #tpu.memory_space<vmem>>, vector<8x3xf32>
    tpu.vector_store %arg3[%c8, %c0_23], %61 {strides = array<i32>} : memref<16x6xf32, #tpu.memory_space<vmem>>, vector<8x3xf32>,
    %63 = vector.extract_strided_slice %4 {offsets = [8, 3], sizes = [8, 3], strides = [1, 1]} : vector<16x6xf32> to vector<8x3xf32>
    %64 = vector.extract_strided_slice %6 {offsets = [8, 3], sizes = [8, 3], strides = [1, 1]} : vector<16x6xf32> to vector<8x3xf32>
    %65 = vector.extract_strided_slice %8 {offsets = [8, 3], sizes = [8, 3], strides = [1, 1]} : vector<16x6xf32> to vector<8x3xf32>
    %cst_24 = arith.constant dense<0.000000e+00> : vector<8x8xf32>
    %66 = tpu.matmul %63, %64, %cst_24 {dimension_numbers = #tpu.dot_dimension_numbers<[1], [1], [0], [0], [0, 0, 1, 0], [], []>} : vector<8x3xf32>, vector<8x3xf32>, vector<8x8xf32> -> vector<8x8xf32>
    %cst_25 = arith.constant 0.577350259 : f32
    %67 = vector.broadcast %cst_25 : f32 to vector<8x8xf32>
    %68 = arith.mulf %66, %67 : vector<8x8xf32>
    %cst_26 = arith.constant dense<0xFF800000> : vector<8xf32>
    %69 = vector.multi_reduction <maximumf>, %68, %cst_26 [1] : vector<8x8xf32> to vector<8xf32>
    %70 = vector.shape_cast %69 : vector<8xf32> to vector<8x1xf32>
    %71 = vector.broadcast %70 : vector<8x1xf32> to vector<8x8xf32>
    %72 = arith.subf %68, %71 : vector<8x8xf32>
    %73 = math.exp %72 : vector<8x8xf32>
    %cst_27 = arith.constant dense<0.000000e+00> : vector<8xf32>
    %74 = vector.multi_reduction <add>, %73, %cst_27 [1] : vector<8x8xf32> to vector<8xf32>
    %75 = vector.shape_cast %74 : vector<8xf32> to vector<8x1xf32>
    %76 = tpu.reciprocal %75 {approx = true} : vector<8x1xf32> -> vector<8x1xf32>
    %77 = vector.broadcast %76 : vector<8x1xf32> to vector<8x8xf32>
    %78 = arith.mulf %73, %77 : vector<8x8xf32>
    %cst_28 = arith.constant dense<0.000000e+00> : vector<8x3xf32>
    %79 = tpu.matmul %78, %65, %cst_28 {dimension_numbers = #tpu.dot_dimension_numbers<[1], [0], [0], [1], [0, 0, 1, 1], [], []>} : vector<8x8xf32>, vector<8x3xf32>, vector<8x3xf32> -> vector<8x3xf32>
    %c8_29 = arith.constant 8 : index
    %c3_30 = arith.constant 3 : index
    %80 = vector.load %arg3[%c8_29, %c3_30] : memref<16x6xf32, #tpu.memory_space<vmem>>, vector<8x3xf32>
    tpu.vector_store %arg3[%c8_29, %c3_30], %79 {strides = array<i32>} : memref<16x6xf32, #tpu.memory_space<vmem>>, vector<8x3xf32>,
    %c0_31 = arith.constant 0 : index
    %c0_32 = arith.constant 0 : index
    %81 = vector.load %arg3[%c0_31, %c0_32] : memref<16x6xf32, #tpu.memory_space<vmem>>, vector<16x6xf32>
    %82 = vector.extract_strided_slice %0 {offsets = [0, 0, 0], sizes = [1, 16, 6], strides = [1, 1, 1]} : vector<3x16x6xf32> to vector<1x16x6xf32>
    %83 = vector.shape_cast %82 : vector<1x16x6xf32> to vector<16x6xf32>
    %84 = arith.addf %83, %81 : vector<16x6xf32>
    %cst_33 = arith.constant dense<0.000000e+00> : vector<16xf32>
    %85 = vector.multi_reduction <add>, %84, %cst_33 [1] : vector<16x6xf32> to vector<16xf32>
    %86 = vector.shape_cast %85 : vector<16xf32> to vector<16x1xf32>
    %cst_34 = arith.constant 6.000000e+00 : f32
    %87 = vector.broadcast %cst_34 : f32 to vector<16x1xf32>
    %88 = arith.divf %86, %87 : vector<16x1xf32>
    %89 = vector.broadcast %88 : vector<16x1xf32> to vector<16x6xf32>
    %90 = arith.subf %84, %89 : vector<16x6xf32>
    %91 = vector.broadcast %88 : vector<16x1xf32> to vector<16x6xf32>
    %92 = arith.subf %84, %91 : vector<16x6xf32>
    %93 = arith.mulf %90, %92 : vector<16x6xf32>
    %cst_35 = arith.constant dense<0.000000e+00> : vector<16xf32>
    %94 = vector.multi_reduction <add>, %93, %cst_35 [1] : vector<16x6xf32> to vector<16xf32>
    %95 = vector.shape_cast %94 : vector<16xf32> to vector<16x1xf32>
    %cst_36 = arith.constant 6.000000e+00 : f32
    %96 = vector.broadcast %cst_36 : f32 to vector<16x1xf32>
    %97 = arith.divf %95, %96 : vector<16x1xf32>
    %98 = vector.broadcast %88 : vector<16x1xf32> to vector<16x6xf32>
    %99 = arith.subf %84, %98 : vector<16x6xf32>
    %cst_37 = arith.constant 9.99999974E-6 : f32
    %100 = vector.broadcast %cst_37 : f32 to vector<16x1xf32>
    %101 = arith.addf %97, %100 : vector<16x1xf32>
    %102 = math.rsqrt %101 : vector<16x1xf32>
    %103 = vector.broadcast %102 : vector<16x1xf32> to vector<16x6xf32>
    %104 = arith.mulf %99, %103 : vector<16x6xf32>
    %c0_38 = arith.constant 0 : index
    %c0_39 = arith.constant 0 : index
    %105 = vector.load %arg2[%c0_38, %c0_39] : memref<2x6xf32, #tpu.memory_space<vmem>>, vector<1x6xf32>
    %c1 = arith.constant 1 : index
    %c0_40 = arith.constant 0 : index
    %106 = vector.load %arg2[%c1, %c0_40] : memref<2x6xf32, #tpu.memory_space<vmem>>, vector<1x6xf32>
    %107 = vector.broadcast %105 : vector<1x6xf32> to vector<16x6xf32>
    %108 = arith.mulf %104, %107 : vector<16x6xf32>
    %109 = vector.broadcast %106 : vector<1x6xf32> to vector<16x6xf32>
    %110 = arith.addf %108, %109 : vector<16x6xf32>
    %c0_41 = arith.constant 0 : index
    %c0_42 = arith.constant 0 : index
    %111 = vector.load %arg3[%c0_41, %c0_42] : memref<16x6xf32, #tpu.memory_space<vmem>>, vector<16x6xf32>
    tpu.vector_store %arg3[%c0_41, %c0_42], %110 {strides = array<i32>} : memref<16x6xf32, #tpu.memory_space<vmem>>, vector<16x6xf32>,
    return
  }
}

</mosaic_0001>

<bundles_post_ra>
// kernel: tpu_custom_call.1
= control target key start
LH: loop header
LB: loop body
LE: loop exit
PB: predicated region body
PF: predicated region fallthrough
CT: control target
= control target key end

     0   :  { %vm30_vm0 = vcmask 1045504   ;;  %vm23_vm1 = vcmask 48128   ;;  %vm121_vm2 = vcmask 23552   ;;  %s509_s29 = smov 125   ;;  %vm149_vm3 = vcmask 64512   ;;  %s510_s6 = smov 3   ;;  %s641_s1 = inlined_call_operand.vmem [shape: f32[3,6,6], index: 1, kind: input, shape index: {}]   ;;  %s642_s0 = inlined_call_operand.vmem [shape: f32[3,16,6], index: 0, kind: input, shape index: {}]   ;;  %s643_s3 = inlined_call_operand.vmem [shape: f32[16,6], index: 3, kind: output, shape index: {}]   ;;  %s644_s2 = inlined_call_operand.vmem [shape: f32[2,6], index: 2, kind: input, shape index: {}]  }
   0x1   :  { %v21_v0 = vld [vmem:[%s641_s1 + $0x8] sm:$0x3f]  ;;  %v16_v1 = vld [vmem:[%s642_s0 + $0x10] sm:$0xff]  ;;  %v20_v2 = vld [vmem:[%s641_s1] sm:$0x3f]  ;;  %vm256_vm4 = vcmask 48152  }
   0x2   :  { %464 = vmatpush.msk.msra.mxu1 %vm30_vm0, %v21_v0  ;;  %461 = vmatpush.msk.msra.mxu0 %vm30_vm0, %v20_v2  ;;  %v544_v3 = vld [vmem:[%s642_s0] sm:$0xff]  ;;  %v22_v4 = vld [vmem:[%s641_s1 + $0x10] sm:$0x3f]  ;;  %v17_v6 = vld [vmem:[%s642_s0 + $0x18] sm:$0xff] }
   0x3   :  { %465 = vmatmul.msk.f32.vlgmr.msra.gmra.mxu1 %vm23_vm1, %v16_v1  ;;  %462 = vmatmul.msk.f32.vlgmr.msra.gmra.mxu0 %vm23_vm1, %v544_v3  ;;  %v18_v5 = vld [vmem:[%s642_s0 + $0x20] sm:$0xff]  ;;  %v562_v7 = vld [vmem:[%s642_s0 + $0x8] sm:$0xff] }
   0x4   :  { %467 = vmatpush.msk.msra.mxu2 %vm30_vm0, %v22_v4  ;;  %v19_v8 = vld [vmem:[%s642_s0 + $0x28] sm:$0xff] }
   0x5   :  { %468 = vmatmul.msk.f32.vlgmr.msra.gmra.mxu2 %vm23_vm1, %v18_v5 }
   0xb   :  { %466 = vmatmul.msk.f32.gmra.mxu1 %vm23_vm1, %v17_v6  ;;  %463 = vmatmul.msk.f32.gmra.mxu0 %vm23_vm1, %v562_v7 }
   0xd   :  { %469 = vmatmul.msk.f32.gmra.mxu2 %vm23_vm1, %v19_v8 }
  0x80   :  { %v83_v9 = vpop.f32.mrf.mxu1  ;;  %v51_v10 = vpop.f32.mrf.mxu0 }
  0x81   :  { %187 = vrot.lane.b32.xlu0 %v83_v9, %s509_s29  ;;  %470 = vmatpush.xpose.msk.msra.mxu3 %vm121_vm2, %v83_v9 }
  0x84   :  { %471 = vmatmul.msk.f32.vlgmr.msra.gmra.mxu3 %vm121_vm2, %v51_v10 }
  0x88   :  { %v86_v11 = vpop.f32.mrf.mxu1  ;;  %v54_v12 = vpop.f32.mrf.mxu0 }
  0x89   :  { %322 = vrot.lane.b32.xlu1 %v86_v11, %s509_s29  ;;  %476 = vmatpush.xpose.msk.msrb.mxu2 %vm121_vm2, %v86_v11  ;;  %v115_v13 = vpop.f32.mrf.mxu2 }
  0x8a   :  { %185 = vrot.lane.b32.xlu0 %v51_v10, %s509_s29  ;;  %179 = vmatpush.msrb.mxu3 %v115_v13 }
  0x8c   :  { %477 = vmatmul.msk.f32.vlgmr.msrb.gmra.mxu2 %vm121_vm2, %v54_v12 }
  0x91   :  { %320 = vrot.lane.b32.xlu1 %v54_v12, %s509_s29  ;;  %v579_v14 = vpop.f32.mrf.mxu2 }
  0x92   :  { %314 = vmatpush.msra.mxu3 %v579_v14 }
  0xf3   :  { %v188_v15 = vpop.permute.xlu0 %187 }
  0xf4   :  { %473 = vmatpush.xpose.msk.msrb.mxu0 %vm121_vm2, %v188_v15  ;;  %v511_v15 = vmov 6.0  }
  0xfb   :  { %v323_v16 = vpop.permute.xlu1 %322 }
  0xfc   :  { %v186_v17 = vpop.permute.xlu0 %185  ;;  %479 = vmatpush.xpose.msk.msra.mxu0 %vm121_vm2, %v323_v16 }
  0xfd   :  { %474 = vmatmul.msk.f32.vlgmr.msrb.gmra.mxu0 %vm121_vm2, %v186_v17 }
 0x103   :  { %v321_v18 = vpop.permute.xlu1 %320 }
 0x105   :  { %480 = vmatmul.msk.f32.vlgmr.msra.gmra.mxu0 %vm121_vm2, %v321_v18 }
 0x107   :  { %v145_v19 = vpop.f32.mrf.mxu3 }
 0x108   :  { %v148_v20 = vmul.f32 0.57735026, %v145_v19 }
 0x10a   :  { %v150_v21 = vsel %vm149_vm3, %v148_v20, -inf }
 0x10b   :  { %151 = vmax.xlane.f32.xlu0 %v150_v21 }
 0x10f   :  { %v281_v22 = vpop.f32.mrf.mxu2 }
 0x110   :  { %v284_v23 = vmul.f32 0.57735026, %v281_v22 }
 0x112   :  { %v285_v24 = vsel %vm149_vm3, %v284_v23, -inf }
 0x113   :  { %286 = vmax.xlane.f32.xlu1 %v285_v24 }
 0x17a   :  { %v210_v25 = vpop.f32.mrf.mxu0 }
 0x17b   :  { %v213_v26 = vmul.f32 0.57735026, %v210_v25 }
 0x17d   :  { %v214_v27 = vsel %vm149_vm3, %v213_v26, -inf }
 0x17e   :  { %215 = vmax.xlane.f32.xlu2 %v214_v27  ;;  %v152_v28 = vpop.xlane.xlu0 %151 }
 0x17f   :  { %v153_v29 = vsub.f32 %v148_v20, %v152_v28 }
 0x181   :  { %v154_v30 = vmul.f32 1.442695, %v153_v29 }
 0x182   :  { %v345_v31 = vpop.f32.mrf.mxu0 }
 0x183   :  { %487 = vpow2.f32 %v154_v30  ;;  %v348_v32 = vmul.f32 0.57735026, %v345_v31 }
 0x185   :  { %v349_v33 = vsel %vm149_vm3, %v348_v32, -inf }
 0x186   :  { %350 = vmax.xlane.f32.xlu2 %v349_v33  ;;  %v287_v34 = vpop.xlane.xlu1 %286 }
 0x187   :  { %v288_v35 = vsub.f32 %v284_v23, %v287_v34 }
 0x189   :  { %v488_v36 = vpop.eup %487  ;;  %v289_v37 = vmul.f32 1.442695, %v288_v35 }
 0x18a   :  { %v156_v38 = vsel %vm149_vm3, %v488_v36, 0.0 }
 0x18b   :  { %489 = vpow2.f32 %v289_v37  ;;  %157 = vadd.xlane.f32.xlu0 %v156_v38 }
 0x191   :  { %v490_v39 = vpop.eup %489 }
 0x192   :  { %v291_v40 = vsel %vm149_vm3, %v490_v39, 0.0 }
 0x193   :  { %292 = vadd.xlane.f32.xlu1 %v291_v40 }
 0x19e   :  { %226 = vrot.lane.b32.xlu2 %v115_v13, %s509_s29 }
 0x1f1   :  { %v216_v41 = vpop.xlane.xlu2 %215 }
 0x1f2   :  { %v217_v42 = vsub.f32 %v213_v26, %v216_v41  ;;  %v486_v41 = vld [vmem:[%s644_s2 + $0x1] ss:$0 sm:$0xff] }
 0x1f4   :  { %v218_v43 = vmul.f32 1.442695, %v217_v42 }
 0x1f6   :  { %491 = vpow2.f32 %v218_v43 }
 0x1f9   :  { %v351_v44 = vpop.xlane.xlu2 %350 }
 0x1fa   :  { %v352_v45 = vsub.f32 %v348_v32, %v351_v44 }
 0x1fc   :  { %v492_v46 = vpop.eup %491  ;;  %v353_v47 = vmul.f32 1.442695, %v352_v45 }
 0x1fd   :  { %v220_v48 = vsel %vm149_vm3, %v492_v46, 0.0 }
 0x1fe   :  { %493 = vpow2.f32 %v353_v47  ;;  %221 = vadd.xlane.f32.xlu2 %v220_v48  ;;  %v158_v49 = vpop.xlane.xlu0 %157 }
 0x1ff   :  { %495 = vrcp.f32 %v158_v49 }
 0x201   :  { %v227_v50 = vpop.permute.xlu2 %226 }
 0x202   :  { %247 = vmatpush.msrb.mxu1 %v227_v50 }
 0x204   :  { %v494_v51 = vpop.eup %493 }
 0x205   :  { %v496_v52 = vpop.eup %495  ;;  %v355_v53 = vsel %vm149_vm3, %v494_v51, 0.0 }
 0x206   :  { %356 = vadd.xlane.f32.xlu2 %v355_v53  ;;  %v293_v54 = vpop.xlane.xlu1 %292  ;;  %v160_v55 = vmul.f32 %v496_v52, %v488_v36 }
 0x207   :  { %497 = vrcp.f32 %v293_v54 }
 0x208   :  { %472 = vmatmul.msk.f32.vlgmr.msrb.gmra.mxu3 %vm149_vm3, %v160_v55 }
 0x20d   :  { %v498_v56 = vpop.eup %497 }
 0x20e   :  { %v295_v57 = vmul.f32 %v498_v56, %v490_v39  ;;  %v485_v39 = vld [vmem:[%s644_s2] ss:$0 sm:$0xff] }
 0x210   :  { %478 = vmatmul.msk.f32.vlgmr.msra.gmra.mxu3 %vm149_vm3, %v295_v57 }
 0x21e   :  { %361 = vrot.lane.b32.xlu2 %v579_v14, %s509_s29 }
 0x271   :  { %v222_v58 = vpop.xlane.xlu2 %221 }
 0x272   :  { %499 = vrcp.f32 %v222_v58 }
 0x278   :  { %v500_v59 = vpop.eup %499 }
 0x279   :  { %v357_v60 = vpop.xlane.xlu2 %356  ;;  %v224_v61 = vmul.f32 %v500_v59, %v492_v46 }
 0x27a   :  { %501 = vrcp.f32 %v357_v60 }
 0x27b   :  { %475 = vmatmul.msk.f32.vlgmr.msrb.gmra.mxu1 %vm149_vm3, %v224_v61  ;;  %503 = vrcp.f32 %v511_v15 }
 0x280   :  { %v502_v62 = vpop.eup %501 }
 0x281   :  { %v359_v63 = vmul.f32 %v502_v62, %v494_v51  ;;  %v362_v0 = vpop.permute.xlu2 %361 }
 0x282   :  { %382 = vmatpush.msra.mxu1 %v362_v0 }
 0x283   :  { %481 = vmatmul.msk.f32.vlgmr.msra.gmra.mxu1 %vm149_vm3, %v359_v63 }
 0x28b   :  { %v181_v1 = vpop.f32.mrf.mxu3 }
 0x28c   :  { %184 = vst.msk [vmem:[%s643_s3] sm:$0xff] %vm121_vm2, %v181_v1 }
 0x293   :  { %v316_v2 = vpop.f32.mrf.mxu3 }
 0x294   :  { %319 = vst.msk [vmem:[%s643_s3 + $0x8] sm:$0xff] %vm121_vm2, %v316_v2 }
 0x2f8   :  { %v249_v4 = vpop.f32.mrf.mxu1 }
 0x2f9   :  { %253 = vrot.lane.b32.xlu2 %v249_v4, %s510_s6 }
 0x300   :  { %v384_v5 = vpop.f32.mrf.mxu1 }
 0x301   :  { %388 = vrot.lane.b32.xlu0 %v384_v5, %s510_s6 }
 0x353   :  { %v254_v6 = vpop.permute.xlu2 %253 }
 0x354   :  { %257 = vst.msk [vmem:[%s643_s3] sm:$0xff] %vm256_vm4, %v254_v6 }
 0x35b   :  { %v392_v8 = vld [vmem:[%s643_s3] sm:$0xff] }
 0x35c   :  { %v394_v9 = vadd.f32 %v392_v8, %v544_v3  ;;  %v504_v3 = vpop.eup %503 }
 0x35d   :  { %v403_v16 = vmul.f32 6.0, %v504_v3  ;;  %vm407_vm5 = vweird.f32 %v504_v3 }
 0x35e   :  { %v396_v10 = vsel %vm23_vm1, %v394_v9, 0.0 }
 0x35f   :  { %397 = vadd.xlane.f32.xlu1 %v396_v10  ;;  %v404_v17 = vsub.f32 1.0, %v403_v16 }
 0x361   :  { %v405_v18 = vmul.f32 %v504_v3, %v404_v17 }
 0x363   :  { %v406_v19 = vadd.f32 %v504_v3, %v405_v18 }
 0x365   :  { %v408_v20 = vsel %vm407_vm5, %v504_v3, %v406_v19 }
 0x373   :  { %v389_v11 = vpop.permute.xlu0 %388 }
 0x374   :  { %391 = vst.msk [vmem:[%s643_s3 + $0x8] sm:$0xff] %vm256_vm4, %v389_v11 }
 0x37b   :  { %v393_v12 = vld [vmem:[%s643_s3 + $0x8] sm:$0xff] }
 0x37c   :  { %v395_v13 = vadd.f32 %v393_v12, %v562_v7 }
 0x37e   :  { %v399_v14 = vsel %vm23_vm1, %v395_v13, 0.0 }
 0x37f   :  { %400 = vadd.xlane.f32.xlu2 %v399_v14 }
 0x3d2   :  { %v398_v21 = vpop.xlane.xlu1 %397 }
 0x3d3   :  { %v409_v22 = vmul.f32 %v408_v20, %v398_v21 }
 0x3d5   :  { %v411_v23 = vsub.f32 %v394_v9, %v409_v22 }
 0x3d7   :  { %v413_v24 = vmul.f32 %v411_v23, %v411_v23 }
 0x3d9   :  { %v415_v25 = vsel %vm23_vm1, %v413_v24, 0.0 }
 0x3da   :  { %416 = vadd.xlane.f32.xlu1 %v415_v25 }
 0x3f2   :  { %v401_v7 = vpop.xlane.xlu2 %400 }
 0x3f3   :  { %v410_v26 = vmul.f32 %v408_v20, %v401_v7 }
 0x3f5   :  { %v412_v27 = vsub.f32 %v395_v13, %v410_v26 }
 0x3f7   :  { %v414_v28 = vmul.f32 %v412_v27, %v412_v27 }
 0x3f9   :  { %v418_v29 = vsel %vm23_vm1, %v414_v28, 0.0 }
 0x3fa   :  { %419 = vadd.xlane.f32.xlu1 %v418_v29 }
 0x44d   :  { %v417_v30 = vpop.xlane.xlu1 %416 }
 0x44e   :  { %v421_v31 = vmul.f32 %v417_v30, %v408_v20 }
 0x450   :  { %v423_v32 = vadd.f32 1e-05, %v421_v31 }
 0x452   :  { %505 = vrsqrt.f32 %v423_v32  ;;  %vm431_vm7 = vweird.f32 %v423_v32 }
 0x458   :  { %v506_v33 = vpop.eup %505 }
 0x459   :  { %v426_v34 = vmul.f32 %v506_v33, %v423_v32  ;;  %vm432_vm6 = vweird.f32 %v506_v33 }
 0x45a   :  { %vm433_vm8 = vmor %vm431_vm7, %vm432_vm6 }
 0x45b   :  { %v427_v35 = vmul.f32 %v506_v33, %v426_v34 }
 0x45d   :  { %v428_v36 = vmul.f32 0.5, %v427_v35 }
 0x45f   :  { %v429_v37 = vsub.f32 1.5, %v428_v36 }
 0x461   :  { %v430_v38 = vmul.f32 %v506_v33, %v429_v37 }
 0x463   :  { %v434_v40 = vsel %vm433_vm8, %v506_v33, %v430_v38 }
 0x464   :  { %v445_v42 = vmul.f32 %v434_v40, %v411_v23 }
 0x466   :  { %v450_v43 = vmul.f32 %v485_v39, %v445_v42 }
 0x468   :  { %v453_v44 = vadd.f32 %v486_v41, %v450_v43 }
 0x46a   :  { %455 = vst.msk [vmem:[%s643_s3] sm:$0xff] %vm23_vm1, %v453_v44 }
 0x46d   :  { %v420_v45 = vpop.xlane.xlu1 %419 }
 0x46e   :  { %v422_v46 = vmul.f32 %v420_v45, %v408_v20 }
 0x470   :  { %v424_v47 = vadd.f32 1e-05, %v422_v46 }
 0x472   :  { %507 = vrsqrt.f32 %v424_v47  ;;  %vm441_vm10 = vweird.f32 %v424_v47 }
 0x478   :  { %v508_v48 = vpop.eup %507 }
 0x479   :  { %v436_v49 = vmul.f32 %v508_v48, %v424_v47  ;;  %vm442_vm9 = vweird.f32 %v508_v48 }
 0x47a   :  { %vm443_vm11 = vmor %vm441_vm10, %vm442_vm9 }
 0x47b   :  { %v437_v50 = vmul.f32 %v508_v48, %v436_v49 }
 0x47d   :  { %v438_v51 = vmul.f32 0.5, %v437_v50 }
 0x47f   :  { %v439_v52 = vsub.f32 1.5, %v438_v51 }
 0x481   :  { %v440_v53 = vmul.f32 %v508_v48, %v439_v52 }
 0x483   :  { %v444_v54 = vsel %vm443_vm11, %v508_v48, %v440_v53 }
 0x484   :  { %v446_v55 = vmul.f32 %v444_v54, %v412_v27 }
 0x486   :  { %v451_v56 = vmul.f32 %v485_v39, %v446_v55 }
 0x488   :  { %v454_v57 = vadd.f32 %v486_v41, %v451_v56 }
 0x48a   :  { %456 = vst.msk [vmem:[%s643_s3 + $0x8] sm:$0xff] %vm23_vm1, %v454_v57 }

</bundles_post_ra>
